<compile_context>
chip_gen: v5e
topology: v5e:2x2
jax: 0.10.0
libtpu: 0.0.40
codegen_flags: <defaults>
</compile_context>

<pallas_src>
import functools

import jax
import jax.numpy as jnp
from jax.experimental import pallas as pl
from jax.experimental.pallas import tpu as pltpu


def _round_up(x, m):
    return (x + m - 1) // m * m


def _matcher_dot_kernel(s_ref, t_ref, wT_ref, b_ref, o_ref):
    tb = s_ref.shape[0]

    # Fuse the two projections: stack s and t along sublanes so the weight is
    # loaded into the MXU once and the bias/tanh stream is merged.
    st = jnp.concatenate([s_ref[...], t_ref[...]], axis=0)          # [2*TB, D_in]
    proj = jnp.dot(st, wT_ref[...], preferred_element_type=jnp.float32)
    # Elementwise / transcendental work in f32 (v5e VPU/EUP have no bf16).
    proj = jnp.tanh(proj.astype(jnp.float32) + b_ref[...].astype(jnp.float32))

    s_proj = proj[:tb]                                              # [TB, D_out]
    t_proj = proj[tb:]                                              # [TB, D_out]

    # keepdims -> 2-D (TB, 1) block; avoids 1-D masked partial stores.
    o_ref[...] = jnp.sum(s_proj * t_proj, axis=-1, keepdims=True)


def matcher_dot(s, t, weight, bias, *, tb=None, compute_dtype=None):
    """s, t: [B, D_in]; weight: [D_out, D_in] (PyTorch layout); bias: [D_out].

    Returns (s @ W.T + b).tanh() * (t @ W.T + b).tanh() summed over the last
    axis, shape [B] float32. `compute_dtype` (e.g. jnp.bfloat16) optionally
    down-casts the matmul operands to cut HBM traffic on v6e/v7x.
    """
    B, D_in = s.shape
    D_out = weight.shape[0]

    wT = weight.T                          # [D_in, D_out]
    b2 = bias.reshape(1, D_out)            # 2-D, correct dim even if non-square

    if compute_dtype is not None:
        s = s.astype(compute_dtype)
        t = t.astype(compute_dtype)
        wT = wT.astype(compute_dtype)

    # Batch tile: multiple of 8 sublanes, capped so the double-buffered s/t
    # tiles stay tiny even under v7x's 32 MiB scoped-VMEM default.
    if tb is None:
        tb = min(512, max(8, _round_up(B, 8)))
    tb = _round_up(tb, 8)
    Bp = _round_up(B, tb)
    if Bp != B:
        pad = Bp - B
        s = jnp.pad(s, ((0, pad), (0, 0)))
        t = jnp.pad(t, ((0, pad), (0, 0)))

    grid = (Bp // tb,)
    in_bytes = s.dtype.itemsize
    cost = pl.CostEstimate(
        flops=2 * (2 * Bp) * D_in * D_out + 3 * Bp * D_out,
        transcendentals=2 * Bp * D_out,
        bytes_accessed=(2 * Bp * D_in + D_in * D_out) * in_bytes
        + D_out * 4 + Bp * 4,
    )

    out = pl.pallas_call(
        _matcher_dot_kernel,
        out_shape=jax.ShapeDtypeStruct((Bp, 1), jnp.float32),
        grid=grid,
        in_specs=[
            pl.BlockSpec((tb, D_in), lambda i: (i, 0)),      # s tile (pipelined)
            pl.BlockSpec((tb, D_in), lambda i: (i, 0)),      # t tile (pipelined)
            pl.BlockSpec((D_in, D_out), lambda i: (0, 0)),   # W^T, VMEM-resident
            pl.BlockSpec((1, D_out), lambda i: (0, 0)),      # bias, VMEM-resident
        ],
        out_specs=pl.BlockSpec((tb, 1), lambda i: (i, 0)),
        compiler_params=pltpu.CompilerParams(
            dimension_semantics=("parallel",)),
        cost_estimate=cost,
    )(s, t, wT, b2)

    return out[:B, 0]


def matcher_dot_ref(s, t, weight, bias):
    sp = jnp.tanh(s @ weight.T + bias)
    tp = jnp.tanh(t @ weight.T + bias)
    return jnp.sum(sp * tp, axis=-1)


if __name__ == "__main__":
    key = jax.random.PRNGKey(0)

    # ---- primary test: module-implied small shapes (batch=8, embedding_dim=32)
    B, D = 8, 32
    k_s, k_t, k_w, k_b, k2 = jax.random.split(key, 5)

    s = jax.random.normal(k_s, (B, D), dtype=jnp.float32)
    t = jax.random.normal(k_t, (B, D), dtype=jnp.float32)
    bound = 1.0 / jnp.sqrt(jnp.float32(D))
    weight = jax.random.uniform(k_w, (D, D), dtype=jnp.float32,
                                minval=-bound, maxval=bound)
    bias = jax.random.uniform(k_b, (D,), dtype=jnp.float32,
                              minval=-bound, maxval=bound)

    out = jax.block_until_ready(matcher_dot(s, t, weight, bias))
    ref = matcher_dot_ref(s, t, weight, bias)
    assert out.shape == (B,)
    assert jnp.allclose(out, ref, atol=1e-5, rtol=1e-5)

    # ---- secondary test: multi-tile grid + batch padding path (B=300, TB=128)
    B2 = 300
    k_s2, k_t2 = jax.random.split(k2)
    s2 = jax.random.normal(k_s2, (B2, D), dtype=jnp.float32)
    t2 = jax.random.normal(k_t2, (B2, D), dtype=jnp.float32)
    out2 = jax.block_until_ready(matcher_dot(s2, t2, weight, bias, tb=128))
    ref2 = matcher_dot_ref(s2, t2, weight, bias)
    assert out2.shape == (B2,)
    assert jnp.allclose(out2, ref2, atol=1e-5, rtol=1e-5)

    # TODO(synk): the `infer=True` branch in the PyTorch source calls
    # `sum(-1)` on a tuple (a bug upstream); only the infer=False path is implemented.

    print("KERNEL_OK")
</pallas_src>

<mosaic_0001>
module attributes {stable_mosaic.version = 11 : i64} {
  func.func @_matcher_dot_kernel(%arg0: i32, %arg1: memref<8x32xf32, #tpu.memory_space<vmem>>, %arg2: memref<8x32xf32, #tpu.memory_space<vmem>>, %arg3: memref<32x32xf32, #tpu.memory_space<vmem>>, %arg4: memref<1x32xf32, #tpu.memory_space<vmem>>, %arg5: memref<8x1xf32, #tpu.memory_space<vmem>>) attributes {dimension_semantics = [#tpu.dimension_semantics<parallel>], iteration_bounds = array<i64: 1>, scalar_prefetch = 0 : i64, scratch_operands = 0 : i64, tpu.core_type = #tpu.core_type<tc>, window_params = [{transform_indices = @transform_0, window_bounds = array<i64: 8, 32>}, {transform_indices = @transform_1, window_bounds = array<i64: 8, 32>}, {pipeline_mode = #tpu.pipeline_mode<synchronous>, transform_indices = @transform_2, window_bounds = array<i64: 32, 32>}, {pipeline_mode = #tpu.pipeline_mode<synchronous>, transform_indices = @transform_3, window_bounds = array<i64: 1, 32>}, {transform_indices = @transform_4, window_bounds = array<i64: 8, 1>}]} {
    %c0 = arith.constant 0 : index
    %c0_0 = arith.constant 0 : index
    %0 = vector.load %arg1[%c0, %c0_0] : memref<8x32xf32, #tpu.memory_space<vmem>>, vector<8x32xf32>
    %c0_1 = arith.constant 0 : index
    %c0_2 = arith.constant 0 : index
    %1 = vector.load %arg2[%c0_1, %c0_2] : memref<8x32xf32, #tpu.memory_space<vmem>>, vector<8x32xf32>
    %2 = tpu.concatenate %0, %1 in 0 : vector<8x32xf32>, vector<8x32xf32> -> vector<16x32xf32>
    %c0_3 = arith.constant 0 : index
    %c0_4 = arith.constant 0 : index
    %3 = vector.load %arg3[%c0_3, %c0_4] : memref<32x32xf32, #tpu.memory_space<vmem>>, vector<32x32xf32>
    %cst = arith.constant dense<0.000000e+00> : vector<16x32xf32>
    %4 = tpu.matmul %2, %3, %cst {dimension_numbers = #tpu.dot_dimension_numbers<[1], [0], [0], [1], [0, 0, 1, 1], [], []>} : vector<16x32xf32>, vector<32x32xf32>, vector<16x32xf32> -> vector<16x32xf32>
    %c0_5 = arith.constant 0 : index
    %c0_6 = arith.constant 0 : index
    %5 = vector.load %arg4[%c0_5, %c0_6] : memref<1x32xf32, #tpu.memory_space<vmem>>, vector<1x32xf32>
    %6 = vector.broadcast %5 : vector<1x32xf32> to vector<16x32xf32>
    %7 = arith.addf %4, %6 : vector<16x32xf32>
    %8 = math.tanh %7 : vector<16x32xf32>
    %9 = vector.extract_strided_slice %8 {offsets = [0, 0], sizes = [8, 32], strides = [1, 1]} : vector<16x32xf32> to vector<8x32xf32>
    %10 = vector.extract_strided_slice %8 {offsets = [8, 0], sizes = [8, 32], strides = [1, 1]} : vector<16x32xf32> to vector<8x32xf32>
    %11 = arith.mulf %9, %10 : vector<8x32xf32>
    %cst_7 = arith.constant dense<0.000000e+00> : vector<8xf32>
    %12 = vector.multi_reduction <add>, %11, %cst_7 [1] : vector<8x32xf32> to vector<8xf32>
    %13 = vector.shape_cast %12 : vector<8xf32> to vector<8x1xf32>
    %c0_8 = arith.constant 0 : index
    %c0_9 = arith.constant 0 : index
    %14 = vector.load %arg5[%c0_8, %c0_9] : memref<8x1xf32, #tpu.memory_space<vmem>>, vector<8x1xf32>
    tpu.vector_store %arg5[%c0_8, %c0_9], %13 {strides = array<i32>} : memref<8x1xf32, #tpu.memory_space<vmem>>, vector<8x1xf32>,
    return
  }
  func.func @transform_0(%arg0: i32) -> (i32, i32) {
    %c0_i32 = arith.constant 0 : i32
    %c0_i32_0 = arith.constant 0 : i32
    return %arg0, %c0_i32 : i32, i32
  }
  func.func @transform_1(%arg0: i32) -> (i32, i32) {
    %c0_i32 = arith.constant 0 : i32
    %c0_i32_0 = arith.constant 0 : i32
    return %arg0, %c0_i32 : i32, i32
  }
  func.func @transform_2(%arg0: i32) -> (i32, i32) {
    %c0_i32 = arith.constant 0 : i32
    %c0_i32_0 = arith.constant 0 : i32
    %c0_i32_1 = arith.constant 0 : i32
    return %c0_i32, %c0_i32_0 : i32, i32
  }
  func.func @transform_3(%arg0: i32) -> (i32, i32) {
    %c0_i32 = arith.constant 0 : i32
    %c0_i32_0 = arith.constant 0 : i32
    %c0_i32_1 = arith.constant 0 : i32
    return %c0_i32, %c0_i32_0 : i32, i32
  }
  func.func @transform_4(%arg0: i32) -> (i32, i32) {
    %c0_i32 = arith.constant 0 : i32
    %c0_i32_0 = arith.constant 0 : i32
    return %arg0, %c0_i32 : i32, i32
  }
}

</mosaic_0001>

<bundles_post_ra>
// kernel: tpu_custom_call.1
= control target key start
LH: loop header
LB: loop body
LE: loop exit
PB: predicated region body
PF: predicated region fallthrough
CT: control target
= control target key end

     0   :  { %9 = vsyncpa [#allocation3], 0  ;;  %s254_s0 = inlined_call_operand.hbm [shape: f32[8,32], index: 0, kind: input, shape index: {}]   ;;  %s255_s1 = inlined_call_operand.hbm [shape: f32[8,32], index: 1, kind: input, shape index: {}]   ;;  %s256_s2 = inlined_call_operand.hbm [shape: f32[32,32], index: 2, kind: input, shape index: {}]   ;;  %s257_s3 = inlined_call_operand.vmem [shape: f32[1,32], index: 3, kind: input, shape index: {}]   ;;  %s258_s4 = inlined_call_operand.vmem [shape: f32[8,1], index: 4, kind: output, shape index: {}]  }
   0x1   :  { %10 = vsyncpa [#allocation5], 0  ;;  %s27_s17 = sshll.u32 %s255_s1, 4  ;;  %s206_s18 = smov [#allocation4]   ;;  %s28_s17 = int_to_ptr.hbm [resolvable:$true] %s27_s17 }
   0x2   :  { %s29_s19 = sshll.u32 %s206_s18, 4  ;;  %s16_s22 = sshll.u32 %s254_s0, 4  ;;  %s30_s19 = int_to_ptr.vmem [resolvable:$true] %s29_s19  ;;  %s17_s22 = int_to_ptr.hbm [resolvable:$true] %s16_s22 }
   0x3   :  { %32 = dma.hbm_to_vmem [thread:$0]  %s28_s17, 128, %s30_s19, [#allocation5]  }
   0x4   :  { %s207_s23 = smov [#allocation2]   ;;  %s37_s27 = sshll.u32 %s256_s2, 4  ;;  %s38_s27 = int_to_ptr.hbm [resolvable:$true] %s37_s27 }
   0x5   :  { %s18_s24 = sshll.u32 %s207_s23, 4  ;;  %s208_s1 = smov [#allocation6]   ;;  %s19_s24 = int_to_ptr.vmem [resolvable:$true] %s18_s24 }
   0x6   :  { %21 = dma.hbm_to_vmem [thread:$0]  %s17_s22, 128, %s19_s24, [#allocation3]  }
   0x7   :  { %s39_s28 = sshll.u32 %s208_s1, 4  ;;  %s209_s29 = smov 128   ;;  %s40_s28 = int_to_ptr.vmem [resolvable:$true] %s39_s28 }
   0x8   :  { %s210_s30 = smov 8  }
   0x9   :  { %45 = dma.hbm_to_vmem [thread:$0]  %s38_s27, 512, %s40_s28, [#allocation5], %s209_s29, %s209_s29, %s210_s30  }
   0xa   :  { %202 = dma.done.wait [#allocation3], 128  }
   0xb   :  { %203 = vsyncadd [#allocation3], 4294967168 }
   0xc   :  { %204 = dma.done.wait [#allocation5], 640  }
   0xd   :  { %205 = vsyncadd [#allocation5], 4294966656  ;;  %v65_v0 = vld [vmem:[#allocation6 + $0x18] sm:$0xff]  ;;  %v64_v1 = vld [vmem:[#allocation6 + $0x10] sm:$0xff]  ;;  %vm70_vm0 = vcmask 261120   ;;  %vm106_vm1 = vcmask 7168  }
   0xe   :  { %89 = vmatpush.msra.mxu0 %v65_v0  ;;  %116 = vmatpush.msra.mxu1 %v65_v0  ;;  %v63_v2 = vld [vmem:[#allocation6 + $0x8] sm:$0xff]  ;;  %v62_v3 = vld [vmem:[#allocation6] sm:$0xff]  ;;  %v60_v4 = vld [vmem:[#allocation2] sm:$0xff] }
   0xf   :  { %v61_v5 = vld [vmem:[#allocation4] sm:$0xff]  ;;  %v125_v6 = vld [vmem:[%s257_s3] ss:$0 sm:$0xff] }
  0x10   :  { %90 = vmatpush.msra.mxu0 %v64_v1  ;;  %117 = vmatpush.msra.mxu1 %v64_v1 }
  0x12   :  { %91 = vmatpush.msra.mxu0 %v63_v2  ;;  %118 = vmatpush.msra.mxu1 %v63_v2 }
  0x14   :  { %92 = vmatpush.msra.mxu0 %v62_v3  ;;  %119 = vmatpush.msra.mxu1 %v62_v3 }
  0x15   :  { %114 = vmatmul.msk.f32.vlgmr.msra.gmra.mxu0 %vm70_vm0, %v60_v4  ;;  %115 = vmatmul.msk.f32.vlgmr.msra.gmra.mxu1 %vm70_vm0, %v61_v5 }
  0x92   :  { %v94_v7 = vpop.f32.mrf.mxu0  ;;  %v97_v8 = vpop.f32.mrf.mxu1 }
  0x93   :  { %v95_v9 = vadd.f32 %v125_v6, %v94_v7  ;;  %v98_v10 = vadd.f32 %v125_v6, %v97_v8 }
  0x95   :  { %126 = vtanh.f32 %v95_v9 }
  0x96   :  { %128 = vtanh.f32 %v98_v10 }
  0x9b   :  { %v127_v11 = vpop.eup %126 }
  0x9c   :  { %v129_v12 = vpop.eup %128 }
  0x9d   :  { %v102_v13 = vmul.f32 %v129_v12, %v127_v11 }
  0x9f   :  { %v103_v14 = vsel %vm70_vm0, %v102_v13, 0.0 }
  0xa0   :  { %104 = vadd.xlane.f32.xlu0 %v103_v14 }
 0x113   :  { %v105_v15 = vpop.xlane.xlu0 %104 }
 0x114   :  { %107 = vst.msk [vmem:[%s258_s4] sm:$0xff] %vm106_vm1, %v105_v15 }
 0x115   :  { %112 = vsyncpa [#allocation3], 1 }
 0x116   :  { %113 = vsyncpa [#allocation5], 1 }

</bundles_post_ra>
